<compile_context>
chip_gen: v7x
topology: tpu7x:2x2x1
jax: 0.10.0
libtpu: 0.0.40
codegen_flags: <defaults>
</compile_context>

<pallas_src>
import math
import functools

import jax
import jax.numpy as jnp
from jax import lax
from jax.experimental import pallas as pl
from jax.experimental.pallas import tpu as pltpu


# Contract the last dims of both operands: (m, k) x (n, k) -> (m, n).
_DN_LAST = (((1,), (1,)), ((), ()))


def _tile(dim, pref):
    """Use the preferred tile if it divides the dim, else the full dim (toy shapes)."""
    return pref if dim % pref == 0 else dim


# --------------------- fused LoRA QKV projection kernel ----------------------

def _lora_qkv_kernel(x_ref, w_ref, a_ref, b_ref, bias_ref, cscale_ref,
                     o_ref, acc_ref, xa_ref, *, scaling):
    k = pl.program_id(2)

    @pl.when(k == 0)
    def _():
        acc_ref[...] = jnp.zeros_like(acc_ref)
        xa_ref[...] = jnp.zeros_like(xa_ref)

    x = x_ref[...]
    # Main projection: x (tm,tk) . W (tn,tk) contracted on last dims -> (tm,tn).
    acc_ref[...] += lax.dot_general(x, w_ref[...], _DN_LAST,
                                    preferred_element_type=jnp.float32)
    # Low-rank path: x (tm,tk) . A (r,tk) -> (tm,r), accumulated over K.
    xa_ref[...] += lax.dot_general(x, a_ref[...], _DN_LAST,
                                   preferred_element_type=jnp.float32)

    @pl.when(k == pl.num_programs(2) - 1)
    def _():
        lora = lax.dot_general(xa_ref[...], b_ref[...], _DN_LAST,
                               preferred_element_type=jnp.float32)   # (tm, tn)
        out = acc_ref[...] + scaling * lora + bias_ref[...]
        # cscale folds 1/sqrt(head_dim) into the Q output columns.
        o_ref[...] = (out * cscale_ref[...]).astype(o_ref.dtype)


def lora_qkv_proj(x2, w, a, b, bias, colscale, scaling, *, tm=256, tn=256, tk=512):
    # x2: (M, E), w: (3E, E), a: (r, E), b: (3E, r) -> (M, 3E)
    M, E = x2.shape
    threeE = w.shape[0]
    r = a.shape[0]
    tm, tn, tk = _tile(M, tm), _tile(threeE, tn), _tile(E, tk)
    grid = (M // tm, threeE // tn, E // tk)
    bias2 = bias.reshape(1, threeE)
    cs2 = colscale.reshape(1, threeE)
    flops = 2 * M * threeE * E + 2 * M * r * E + 2 * M * threeE * r
    bytes_accessed = 4 * (M * E + threeE * E + r * E + threeE * r + M * threeE)
    return pl.pallas_call(
        functools.partial(_lora_qkv_kernel, scaling=scaling),
        out_shape=jax.ShapeDtypeStruct((M, threeE), x2.dtype),
        grid=grid,
        in_specs=[
            pl.BlockSpec((tm, tk), lambda i, j, k: (i, k)),   # x
            pl.BlockSpec((tn, tk), lambda i, j, k: (j, k)),   # W (un-transposed)
            pl.BlockSpec((r, tk), lambda i, j, k: (0, k)),    # A
            pl.BlockSpec((tn, r), lambda i, j, k: (j, 0)),    # B
            pl.BlockSpec((1, tn), lambda i, j, k: (0, j)),    # bias
            pl.BlockSpec((1, tn), lambda i, j, k: (0, j)),    # per-column scale
        ],
        out_specs=pl.BlockSpec((tm, tn), lambda i, j, k: (i, j)),
        scratch_shapes=[pltpu.VMEM((tm, tn), jnp.float32),
                        pltpu.VMEM((tm, r), jnp.float32)],
        compiler_params=pltpu.CompilerParams(
            dimension_semantics=("parallel", "parallel", "arbitrary")),
        cost_estimate=pl.CostEstimate(flops=flops, transcendentals=0,
                                      bytes_accessed=bytes_accessed),
    )(x2, w, a, b, bias2, cs2)


# ----------------------- batched-head attention kernel -----------------------

def _mha_kernel(qkv_ref, o_ref, p_ref, *, num_heads, head_dim):
    # One batch element per grid step; all heads handled here (amortizes the
    # ~0.35us/step grid overhead and keeps the probs write H-times smaller).
    qkv = qkv_ref[...]                                 # (L, 3E), leading dim squeezed
    E = num_heads * head_dim
    p_sum = None
    o_parts = []
    for h in range(num_heads):                         # static unroll over heads
        q = qkv[:, h * head_dim:(h + 1) * head_dim]            # (L, Dh), pre-scaled
        k = qkv[:, E + h * head_dim:E + (h + 1) * head_dim]    # (L, Dh)
        v = qkv[:, 2 * E + h * head_dim:2 * E + (h + 1) * head_dim]
        # Transposed contraction handed to the MXU directly (no in-kernel k.T).
        s = lax.dot_general(q, k, _DN_LAST, preferred_element_type=jnp.float32)
        s = s - jnp.max(s, axis=-1, keepdims=True)
        e = jnp.exp(s)
        p = e / jnp.sum(e, axis=-1, keepdims=True)             # (L, L)
        o_parts.append(jnp.dot(p, v, preferred_element_type=jnp.float32))
        p_sum = p if p_sum is None else p_sum + p
    # Single lane-dense (L, E) write instead of per-head narrow stores.
    o_ref[...] = jnp.concatenate(o_parts, axis=-1).astype(o_ref.dtype)
    # Head-averaged attention weights computed in-kernel.
    p_ref[...] = (p_sum * (1.0 / num_heads)).astype(p_ref.dtype)


def mha_heads(qkv_nle, num_heads):
    # qkv_nle: (N, L, 3E) -> attn_out (N, L, E), avg probs (N, L, L)
    N, L, threeE = qkv_nle.shape
    E = threeE // 3
    head_dim = E // num_heads
    flops = N * num_heads * (4 * L * L * head_dim)
    bytes_accessed = 4 * (N * L * threeE + N * L * E + N * L * L)
    return pl.pallas_call(
        functools.partial(_mha_kernel, num_heads=num_heads, head_dim=head_dim),
        out_shape=(jax.ShapeDtypeStruct((N, L, E), qkv_nle.dtype),
                   jax.ShapeDtypeStruct((N, L, L), jnp.float32)),
        grid=(N,),
        in_specs=[pl.BlockSpec((None, L, threeE), lambda n: (n, 0, 0))],
        out_specs=(pl.BlockSpec((None, L, E), lambda n: (n, 0, 0)),
                   pl.BlockSpec((None, L, L), lambda n: (n, 0, 0))),
        compiler_params=pltpu.CompilerParams(dimension_semantics=("parallel",)),
        cost_estimate=pl.CostEstimate(flops=flops,
                                      transcendentals=N * num_heads * L * L,
                                      bytes_accessed=bytes_accessed),
    )(qkv_nle)


# --------------------------- tiled GEMM + bias --------------------------------

def _gemm_bias_kernel(x_ref, w_ref, b_ref, o_ref, acc_ref):
    k = pl.program_id(2)

    @pl.when(k == 0)
    def _():
        acc_ref[...] = jnp.zeros_like(acc_ref)

    acc_ref[...] += lax.dot_general(x_ref[...], w_ref[...], _DN_LAST,
                                    preferred_element_type=jnp.float32)

    @pl.when(k == pl.num_programs(2) - 1)
    def _():
        o_ref[...] = (acc_ref[...] + b_ref[...]).astype(o_ref.dtype)


def gemm_bias(x2, w, bias, *, tm=256, tn=256, tk=512):
    # out = x2 @ w.T + bias, with w passed un-transposed: x2 (M,K), w (Nout,K).
    M, K = x2.shape
    Nout = w.shape[0]
    tm, tn, tk = _tile(M, tm), _tile(Nout, tn), _tile(K, tk)
    grid = (M // tm, Nout // tn, K // tk)
    bias2 = bias.reshape(1, Nout)
    return pl.pallas_call(
        _gemm_bias_kernel,
        out_shape=jax.ShapeDtypeStruct((M, Nout), x2.dtype),
        grid=grid,
        in_specs=[
            pl.BlockSpec((tm, tk), lambda i, j, k: (i, k)),
            pl.BlockSpec((tn, tk), lambda i, j, k: (j, k)),
            pl.BlockSpec((1, tn), lambda i, j, k: (0, j)),
        ],
        out_specs=pl.BlockSpec((tm, tn), lambda i, j, k: (i, j)),
        scratch_shapes=[pltpu.VMEM((tm, tn), jnp.float32)],
        compiler_params=pltpu.CompilerParams(
            dimension_semantics=("parallel", "parallel", "arbitrary")),
        cost_estimate=pl.CostEstimate(
            flops=2 * M * Nout * K, transcendentals=0,
            bytes_accessed=4 * (M * K + Nout * K + M * Nout)),
    )(x2, w, bias2)


# ------------------------------ forward glue ----------------------------------

def attention_lora_forward(x, params, *, num_heads, alpha, rank):
    """Forward of AttentionLoRA: LoRA-merged in_proj, MHA self-attention."""
    scaling = alpha / rank
    L, N, E = x.shape
    Dh = E // num_heads

    # (L, N, E) -> (N, L, E) -> (N*L, E): batch-major rows so each attention grid
    # step reads one contiguous (L, 3E) slab (no wrapper split / head transposes).
    x2 = x.transpose(1, 0, 2).reshape(N * L, E)

    # 1/sqrt(Dh) folded into the Q output columns of the projection.
    colscale = jnp.concatenate([
        jnp.full((E,), 1.0 / math.sqrt(Dh), jnp.float32),
        jnp.ones((2 * E,), jnp.float32),
    ])

    qkv = lora_qkv_proj(x2, params["in_proj_weight"], params["A"], params["B"],
                        params["in_proj_bias"], colscale, scaling)
    qkv = qkv.reshape(N, L, 3 * E)

    attn_nle, attn_weights = mha_heads(qkv, num_heads)

    out2 = gemm_bias(attn_nle.reshape(N * L, E),
                     params["out_proj_weight"], params["out_proj_bias"])
    out = out2.reshape(N, L, E).transpose(1, 0, 2)

    # NOTE: _un_merge_weights restores the original in_proj_weight; we never
    # mutated it (LoRA is applied functionally), so there is nothing to undo.
    return out, attn_weights


def reference_forward(x, params, *, num_heads, alpha, rank):
    """Pure-JAX reference mirroring the PyTorch module for correctness checking."""
    scaling = alpha / rank
    L, N, E = x.shape
    Dh = E // num_heads
    w = params["in_proj_weight"] + scaling * (params["B"] @ params["A"]).reshape(3 * E, E)
    qkv = x.reshape(L * N, E) @ w.T + params["in_proj_bias"]
    q, k, v = jnp.split(qkv.reshape(L, N, 3 * E), 3, axis=-1)
    th = lambda t: t.reshape(L, N * num_heads, Dh).transpose(1, 0, 2)
    qh, kh, vh = th(q), th(k), th(v)
    s = jnp.einsum("bld,bmd->blm", qh / math.sqrt(Dh), kh)
    p = jax.nn.softmax(s, axis=-1)
    o = jnp.einsum("blm,bmd->bld", p, vh)
    o = o.transpose(1, 0, 2).reshape(L * N, E)
    o = o @ params["out_proj_weight"].T + params["out_proj_bias"]
    return o.reshape(L, N, E), p.reshape(N, num_heads, L, L).mean(axis=1)


# ----------------------------------- main --------------------------------------

if __name__ == "__main__":
    L, N, E, H = 8, 2, 32, 4          # seq, batch, embed, heads
    rank, alpha = 1, 8.0

    key = jax.random.PRNGKey(0)
    k1, k2, k3, k4, k5, k6, k7 = jax.random.split(key, 7)

    params = {
        # Wrapped nn.MultiheadAttention parameters (deterministic synthetic init).
        "in_proj_weight": 0.1 * jax.random.normal(k1, (3 * E, E), jnp.float32),
        "in_proj_bias": 0.1 * jax.random.normal(k5, (3 * E,), jnp.float32),
        "out_proj_weight": 0.1 * jax.random.normal(k2, (E, E), jnp.float32),
        "out_proj_bias": 0.1 * jax.random.normal(k6, (E,), jnp.float32),
        # LoRA parameters (B is zero at init in the module; made nonzero here so
        # the low-rank path is actually exercised).
        "B": 0.1 * jax.random.normal(k7, (3 * E, rank), jnp.float32),
        "A": math.sqrt(2.0 / E) * jax.random.normal(k3, (rank, E), jnp.float32),
    }

    x = jax.random.normal(k4, (L, N, E), jnp.float32)

    out, attn = attention_lora_forward(x, params, num_heads=H, alpha=alpha, rank=rank)
    jax.block_until_ready((out, attn))

    ref_out, ref_attn = reference_forward(x, params, num_heads=H, alpha=alpha, rank=rank)
    assert jnp.allclose(out, ref_out, atol=1e-4, rtol=1e-4)
    assert jnp.allclose(attn, ref_attn, atol=1e-4, rtol=1e-4)

    print("KERNEL_OK")
</pallas_src>

<mosaic_0001>
module attributes {stable_mosaic.version = 11 : i64} {
  func.func @_lora_qkv_kernel(%arg0: i32, %arg1: i32, %arg2: i32, %arg3: memref<16x32xf32, #tpu.memory_space<vmem>>, %arg4: memref<96x32xf32, #tpu.memory_space<vmem>>, %arg5: memref<1x32xf32, #tpu.memory_space<vmem>>, %arg6: memref<96x1xf32, #tpu.memory_space<vmem>>, %arg7: memref<1x96xf32, #tpu.memory_space<vmem>>, %arg8: memref<1x96xf32, #tpu.memory_space<vmem>>, %arg9: memref<16x96xf32, #tpu.memory_space<vmem>>, %arg10: memref<16x96xf32, #tpu.memory_space<vmem>>, %arg11: memref<16x1xf32, #tpu.memory_space<vmem>>) attributes {dimension_semantics = [#tpu.dimension_semantics<parallel>, #tpu.dimension_semantics<parallel>, #tpu.dimension_semantics<arbitrary>], iteration_bounds = array<i64: 1, 1, 1>, scalar_prefetch = 0 : i64, scratch_operands = 2 : i64, tpu.core_type = #tpu.core_type<tc>, window_params = [{transform_indices = @transform_0, window_bounds = array<i64: 16, 32>}, {transform_indices = @transform_1, window_bounds = array<i64: 96, 32>}, {transform_indices = @transform_2, window_bounds = array<i64: 1, 32>}, {transform_indices = @transform_3, window_bounds = array<i64: 96, 1>}, {transform_indices = @transform_4, window_bounds = array<i64: 1, 96>}, {transform_indices = @transform_5, window_bounds = array<i64: 1, 96>}, {transform_indices = @transform_6, window_bounds = array<i64: 16, 96>}]} {
    %c0_i32 = arith.constant 0 : i32
    %0 = arith.cmpi eq, %arg2, %c0_i32 : i32
    %1 = arith.extui %0 : i1 to i32
    %c0_i32_0 = arith.constant 0 : i32
    %2 = arith.cmpi ne, %1, %c0_i32_0 : i32
    scf.if %2 {
      %cst_17 = arith.constant 0.000000e+00 : f32
      %17 = vector.broadcast %cst_17 : f32 to vector<16x96xf32>
      %c0_18 = arith.constant 0 : index
      %c0_19 = arith.constant 0 : index
      %18 = vector.load %arg10[%c0_18, %c0_19] : memref<16x96xf32, #tpu.memory_space<vmem>>, vector<16x96xf32>
      tpu.vector_store %arg10[%c0_18, %c0_19], %17 {strides = array<i32>} : memref<16x96xf32, #tpu.memory_space<vmem>>, vector<16x96xf32>,
      %cst_20 = arith.constant 0.000000e+00 : f32
      %19 = vector.broadcast %cst_20 : f32 to vector<16x1xf32>
      %c0_21 = arith.constant 0 : index
      %c0_22 = arith.constant 0 : index
      %20 = vector.load %arg11[%c0_21, %c0_22] : memref<16x1xf32, #tpu.memory_space<vmem>>, vector<16x1xf32>
      tpu.vector_store %arg11[%c0_21, %c0_22], %19 {strides = array<i32>} : memref<16x1xf32, #tpu.memory_space<vmem>>, vector<16x1xf32>,
    } else {
    }
    %c0 = arith.constant 0 : index
    %c0_1 = arith.constant 0 : index
    %3 = vector.load %arg3[%c0, %c0_1] : memref<16x32xf32, #tpu.memory_space<vmem>>, vector<16x32xf32>
    %c0_2 = arith.constant 0 : index
    %c0_3 = arith.constant 0 : index
    %4 = vector.load %arg10[%c0_2, %c0_3] : memref<16x96xf32, #tpu.memory_space<vmem>>, vector<16x96xf32>
    %c0_4 = arith.constant 0 : index
    %c0_5 = arith.constant 0 : index
    %5 = vector.load %arg4[%c0_4, %c0_5] : memref<96x32xf32, #tpu.memory_space<vmem>>, vector<96x32xf32>
    %cst = arith.constant dense<0.000000e+00> : vector<16x96xf32>
    %6 = tpu.matmul %3, %5, %cst {dimension_numbers = #tpu.dot_dimension_numbers<[1], [1], [0], [0], [0, 0, 1, 0], [], []>} : vector<16x32xf32>, vector<96x32xf32>, vector<16x96xf32> -> vector<16x96xf32>
    %7 = arith.addf %4, %6 : vector<16x96xf32>
    %c0_6 = arith.constant 0 : index
    %c0_7 = arith.constant 0 : index
    %8 = vector.load %arg10[%c0_6, %c0_7] : memref<16x96xf32, #tpu.memory_space<vmem>>, vector<16x96xf32>
    tpu.vector_store %arg10[%c0_6, %c0_7], %7 {strides = array<i32>} : memref<16x96xf32, #tpu.memory_space<vmem>>, vector<16x96xf32>,
    %c0_8 = arith.constant 0 : index
    %c0_9 = arith.constant 0 : index
    %9 = vector.load %arg11[%c0_8, %c0_9] : memref<16x1xf32, #tpu.memory_space<vmem>>, vector<16x1xf32>
    %c0_10 = arith.constant 0 : index
    %c0_11 = arith.constant 0 : index
    %10 = vector.load %arg5[%c0_10, %c0_11] : memref<1x32xf32, #tpu.memory_space<vmem>>, vector<1x32xf32>
    %cst_12 = arith.constant dense<0.000000e+00> : vector<16x1xf32>
    %11 = tpu.matmul %3, %10, %cst_12 {dimension_numbers = #tpu.dot_dimension_numbers<[1], [1], [0], [0], [0, 0, 1, 0], [], []>} : vector<16x32xf32>, vector<1x32xf32>, vector<16x1xf32> -> vector<16x1xf32>
    %12 = arith.addf %9, %11 : vector<16x1xf32>
    %c0_13 = arith.constant 0 : index
    %c0_14 = arith.constant 0 : index
    %13 = vector.load %arg11[%c0_13, %c0_14] : memref<16x1xf32, #tpu.memory_space<vmem>>, vector<16x1xf32>
    tpu.vector_store %arg11[%c0_13, %c0_14], %12 {strides = array<i32>} : memref<16x1xf32, #tpu.memory_space<vmem>>, vector<16x1xf32>,
    %c0_i32_15 = arith.constant 0 : i32
    %14 = arith.cmpi eq, %arg2, %c0_i32_15 : i32
    %15 = arith.extui %14 : i1 to i32
    %c0_i32_16 = arith.constant 0 : i32
    %16 = arith.cmpi ne, %15, %c0_i32_16 : i32
    scf.if %16 {
      %c0_17 = arith.constant 0 : index
      %c0_18 = arith.constant 0 : index
      %17 = vector.load %arg11[%c0_17, %c0_18] : memref<16x1xf32, #tpu.memory_space<vmem>>, vector<16x1xf32>
      %c0_19 = arith.constant 0 : index
      %c0_20 = arith.constant 0 : index
      %18 = vector.load %arg6[%c0_19, %c0_20] : memref<96x1xf32, #tpu.memory_space<vmem>>, vector<96x1xf32>
      %cst_21 = arith.constant dense<0.000000e+00> : vector<16x96xf32>
      %19 = tpu.matmul %17, %18, %cst_21 {dimension_numbers = #tpu.dot_dimension_numbers<[1], [1], [0], [0], [0, 0, 1, 0], [], []>} : vector<16x1xf32>, vector<96x1xf32>, vector<16x96xf32> -> vector<16x96xf32>
      %c0_22 = arith.constant 0 : index
      %c0_23 = arith.constant 0 : index
      %20 = vector.load %arg10[%c0_22, %c0_23] : memref<16x96xf32, #tpu.memory_space<vmem>>, vector<16x96xf32>
      %cst_24 = arith.constant 8.000000e+00 : f32
      %21 = vector.broadcast %cst_24 : f32 to vector<16x96xf32>
      %22 = arith.mulf %21, %19 : vector<16x96xf32>
      %23 = arith.addf %20, %22 : vector<16x96xf32>
      %c0_25 = arith.constant 0 : index
      %c0_26 = arith.constant 0 : index
      %24 = vector.load %arg7[%c0_25, %c0_26] : memref<1x96xf32, #tpu.memory_space<vmem>>, vector<1x96xf32>
      %25 = vector.broadcast %24 : vector<1x96xf32> to vector<16x96xf32>
      %26 = arith.addf %23, %25 : vector<16x96xf32>
      %c0_27 = arith.constant 0 : index
      %c0_28 = arith.constant 0 : index
      %27 = vector.load %arg8[%c0_27, %c0_28] : memref<1x96xf32, #tpu.memory_space<vmem>>, vector<1x96xf32>
      %28 = vector.broadcast %27 : vector<1x96xf32> to vector<16x96xf32>
      %29 = arith.mulf %26, %28 : vector<16x96xf32>
      %c0_29 = arith.constant 0 : index
      %c0_30 = arith.constant 0 : index
      %30 = vector.load %arg9[%c0_29, %c0_30] : memref<16x96xf32, #tpu.memory_space<vmem>>, vector<16x96xf32>
      tpu.vector_store %arg9[%c0_29, %c0_30], %29 {strides = array<i32>} : memref<16x96xf32, #tpu.memory_space<vmem>>, vector<16x96xf32>,
    } else {
    }
    return
  }
  func.func @transform_0(%arg0: i32, %arg1: i32, %arg2: i32) -> (i32, i32) {
    %c0_i32 = arith.constant 0 : i32
    return %arg0, %arg2 : i32, i32
  }
  func.func @transform_1(%arg0: i32, %arg1: i32, %arg2: i32) -> (i32, i32) {
    %c0_i32 = arith.constant 0 : i32
    return %arg1, %arg2 : i32, i32
  }
  func.func @transform_2(%arg0: i32, %arg1: i32, %arg2: i32) -> (i32, i32) {
    %c0_i32 = arith.constant 0 : i32
    %c0_i32_0 = arith.constant 0 : i32
    return %c0_i32, %arg2 : i32, i32
  }
  func.func @transform_3(%arg0: i32, %arg1: i32, %arg2: i32) -> (i32, i32) {
    %c0_i32 = arith.constant 0 : i32
    %c0_i32_0 = arith.constant 0 : i32
    return %arg1, %c0_i32 : i32, i32
  }
  func.func @transform_4(%arg0: i32, %arg1: i32, %arg2: i32) -> (i32, i32) {
    %c0_i32 = arith.constant 0 : i32
    %c0_i32_0 = arith.constant 0 : i32
    return %c0_i32, %arg1 : i32, i32
  }
  func.func @transform_5(%arg0: i32, %arg1: i32, %arg2: i32) -> (i32, i32) {
    %c0_i32 = arith.constant 0 : i32
    %c0_i32_0 = arith.constant 0 : i32
    return %c0_i32, %arg1 : i32, i32
  }
  func.func @transform_6(%arg0: i32, %arg1: i32, %arg2: i32) -> (i32, i32) {
    %c0_i32 = arith.constant 0 : i32
    return %arg0, %arg1 : i32, i32
  }
}

</mosaic_0001>

<bundles_post_ra>
// kernel: tpu_custom_call.1
= control target key start
LH: loop header
LB: loop body
LE: loop exit
PB: predicated region body
PF: predicated region fallthrough
CT: control target
= control target key end

     0   :  { %vm50_vm0 = vcmask 261120   ;;  %vm31_vm1 = vcmask 7168   ;;  %s802_s0 = inlined_call_operand.vmem [shape: f32[16,32], index: 0, kind: input, shape index: {}]   ;;  %s803_s1 = inlined_call_operand.vmem [shape: f32[96,32], index: 1, kind: input, shape index: {}]   ;;  %s804_s2 = inlined_call_operand.vmem [shape: f32[1,32], index: 2, kind: input, shape index: {}]   ;;  %s805_s3 = inlined_call_operand.vmem [shape: f32[96,1], index: 3, kind: input, shape index: {}]   ;;  %s806_s4 = inlined_call_operand.vmem [shape: f32[1,96], index: 4, kind: input, shape index: {}]   ;;  %s807_s5 = inlined_call_operand.vmem [shape: f32[1,96], index: 5, kind: input, shape index: {}]   ;;  %s808_s6 = inlined_call_operand.hbm [shape: f32[16,96], index: 6, kind: output, shape index: {}]  }
   0x1   :  { %v34_v0 = vld [vmem:[%s802_s0] sm:$0xff]  ;;  %v632_v2 = vld [vmem:[%s802_s0 + $0x8] sm:$0xff]  ;;  %vm636_vm2 = vmpackc.low %vm50_vm0, %vm50_vm0 }
   0x2   :  { %v385_v1 = vld [vmem:[%s804_s2] ss:$0 sm:$0xff]  ;;  %v39_v7 = vld [vmem:[%s803_s1 + $0x8] sm:$0xff]  ;;  %454 = vmatprep.mubr.msk.f32.mxu0 %vm50_vm0, %v34_v0  ;;  %v40_v9 = vld [vmem:[%s803_s1 + $0x10] sm:$0xff] }
   0x3   :  { %v182_v4 = vmul.f32 %v385_v1, %v34_v0  ;;  %v183_v5 = vmul.f32 %v385_v1, %v632_v2  ;;  %v38_v6 = vld [vmem:[%s803_s1] sm:$0xff]  ;;  %v41_v10 = vld [vmem:[%s803_s1 + $0x18] sm:$0xff]  ;;  %v201_v14 = vld [vmem:[%s805_s3 + $0x8] sm:$0xff] }
   0x4   :  { %v484_v8 = vpack.c.bf16 %v39_v7, %v38_v6  ;;  %v200_v11 = vld [vmem:[%s805_s3] sm:$0xff]  ;;  %v490_v13 = vpack.c.bf16 %v41_v10, %v40_v9  ;;  %vm663_vm3 = vmpackc.low %vm31_vm1, %vm31_vm1  ;;  %v202_v17 = vld [vmem:[%s805_s3 + $0x10] sm:$0xff] }
   0x5   :  { %v184_v12 = vsel %vm50_vm0, %v182_v4, 0.0  ;;  %v520_v16 = vpack.c.bf16 %v201_v14, %v200_v11  ;;  %v203_v18 = vld [vmem:[%s805_s3 + $0x18] sm:$0xff]  ;;  %v187_v19 = vsel %vm50_vm0, %v183_v5, 0.0  ;;  %v42_v21 = vld [vmem:[%s803_s1 + $0x20] sm:$0xff]  ;;  %v43_v22 = vld [vmem:[%s803_s1 + $0x28] sm:$0xff] }
   0x6   :  { %185 = vadd.xlane.f32.xlu0 %v184_v12  ;;  %486 = vmatprep.subr.msk.bf16.mxu0 %vm636_vm2, %v484_v8  ;;  %v526_v20 = vpack.c.bf16 %v203_v18, %v202_v17  ;;  %v204_v23 = vld [vmem:[%s805_s3 + $0x20] sm:$0xff]  ;;  %v205_v24 = vld [vmem:[%s805_s3 + $0x28] sm:$0xff] }
   0x7   :  { %489 = vmatpush3.bf16.xpose.msk.msra.mxu0 %vm636_vm2, %v484_v8  ;;  %522 = vmatprep.subr.msk.bf16.mxu1 %vm663_vm3, %v520_v16 }
   0x8   :  { %492 = vmatprep.subr.msk.bf16.mxu0 %vm636_vm2, %v490_v13  ;;  %525 = vmatpush3.bf16.xpose.msk.msra.mxu1 %vm663_vm3, %v520_v16 }
   0x9   :  { %528 = vmatprep.subr.msk.bf16.mxu1 %vm663_vm3, %v526_v20 }
   0xa   :  { %188 = vadd.xlane.f32.xlu0 %v187_v19 }
   0xb   :  { %11 = vsyncpa [#allocation5], 0  ;;  %v496_v25 = vpack.c.bf16 %v43_v22, %v42_v21  ;;  %v584_v26 = vmov 0.0   ;;  %v532_v27 = vpack.c.bf16 %v205_v24, %v204_v23  ;;  %v44_v28 = vld [vmem:[%s803_s1 + $0x30] sm:$0xff]  ;;  %v45_v29 = vld [vmem:[%s803_s1 + $0x38] sm:$0xff]  ;;  %vm28_vm4 = vcmask 785408  }
   0xc   :  { %32 = vst.msk [vmem:[#allocation3] sm:$0xff] %vm31_vm1, %v584_v26  ;;  %33 = vst.msk [vmem:[#allocation3 + $0x8] sm:$0xff] %vm31_vm1, %v584_v26  ;;  %v206_v30 = vld [vmem:[%s805_s3 + $0x30] sm:$0xff]  ;;  %v207_v31 = vld [vmem:[%s805_s3 + $0x38] sm:$0xff]  ;;  %v502_v32 = vpack.c.bf16 %v45_v29, %v44_v28  ;;  %s585_s25 = smov [#allocation4]  }
   0xd   :  { %v538_v33 = vpack.c.bf16 %v207_v31, %v206_v30  ;;  %v46_v34 = vld [vmem:[%s803_s1 + $0x40] sm:$0xff]  ;;  %v47_v35 = vld [vmem:[%s803_s1 + $0x48] sm:$0xff]  ;;  %v48_v40 = vld [vmem:[%s803_s1 + $0x50] sm:$0xff]  ;;  %30 = vst.msk [vmem:[#allocation2 + $0x8] sm:$0xff] %vm28_vm4, %v584_v26  ;;  %s360_s26 = sshll.u32 %s585_s25, 4  ;;  %s361_s26 = int_to_ptr.vmem [resolvable:$true] %s360_s26 }
   0xe   :  { %v208_v36 = vld [vmem:[%s805_s3 + $0x40] sm:$0xff]  ;;  %v209_v37 = vld [vmem:[%s805_s3 + $0x48] sm:$0xff]  ;;  %v508_v38 = vpack.c.bf16 %v47_v35, %v46_v34  ;;  %v49_v41 = vld [vmem:[%s803_s1 + $0x58] sm:$0xff]  ;;  %29 = vst.msk [vmem:[#allocation2] sm:$0xff] %vm28_vm4, %v584_v26  ;;  %s560_s27 = scalar_lea.vmem %s361_s26, 256  ;;  %p565_p1 = scmp.lt.s32.totalorder %s361_s26, %s361_s26 }
   0xf   :  { %495 = vmatpush3.bf16.xpose.msk.msra.mxu0 %vm636_vm2, %v490_v13  ;;  %v544_v39 = vpack.c.bf16 %v209_v37, %v208_v36  ;;  %v210_v42 = vld [vmem:[%s805_s3 + $0x50] sm:$0xff]  ;;  %v211_v43 = vld [vmem:[%s805_s3 + $0x58] sm:$0xff]  ;;  %v514_v44 = vpack.c.bf16 %v49_v41, %v48_v40  ;;  %v400_v1 = vld [vmem:[%s806_s4] ss:$0 sm:$0xff]  ;;  %p561_p0 = scmp.ne.s32.totalorder %s361_s26, %s560_s27  ;;  %p566_p2 = scmp.lt.s32.totalorder %s560_s27, %s560_s27 }
  0x10   :  { %498 = vmatprep.subr.msk.bf16.mxu0 %vm636_vm2, %v496_v25  ;;  %531 = vmatpush3.bf16.xpose.msk.msra.mxu1 %vm663_vm3, %v526_v20  ;;  %v550_v45 = vpack.c.bf16 %v211_v43, %v210_v42  ;;  %v401_v4 = vld [vmem:[%s807_s5] ss:$0 sm:$0xff] }
  0x11   :  { %534 = vmatprep.subr.msk.bf16.mxu1 %vm663_vm3, %v532_v27  ;;  %p567_p3 = por %p566_p2, %p565_p1 }
  0x13   :  { %v173_v46 = vld [vmem:[#allocation3] sm:$0xff]  ;;  %v174_v49 = vld [vmem:[#allocation3 + $0x8] sm:$0xff]  ;;  %p568_p4 = pnand %p567_p3, %p561_p0 }
  0x14   :  { %v37_v54 = vld [vmem:[#allocation2 + $0x8] sm:$0xff] }
  0x15   :  { %v36_v55 = vld [vmem:[#allocation2] sm:$0xff] }
  0x17   :  { %501 = vmatpush3.bf16.xpose.msk.msra.mxu0 %vm636_vm2, %v496_v25 }
  0x18   :  { %504 = vmatprep.subr.msk.bf16.mxu0 %vm636_vm2, %v502_v32  ;;  %537 = vmatpush3.bf16.xpose.msk.msra.mxu1 %vm663_vm3, %v532_v27 }
  0x19   :  { %540 = vmatprep.subr.msk.bf16.mxu1 %vm663_vm3, %v538_v33 }
  0x1f   :  { %507 = vmatpush3.bf16.xpose.msk.msra.mxu0 %vm636_vm2, %v502_v32 }
  0x20   :  { %510 = vmatprep.subr.msk.bf16.mxu0 %vm636_vm2, %v508_v38  ;;  %543 = vmatpush3.bf16.xpose.msk.msra.mxu1 %vm663_vm3, %v538_v33 }
  0x21   :  { %546 = vmatprep.subr.msk.bf16.mxu1 %vm663_vm3, %v544_v39 }
  0x27   :  { %513 = vmatpush3.bf16.xpose.msk.msra.mxu0 %vm636_vm2, %v508_v38 }
  0x28   :  { %516 = vmatprep.subr.msk.bf16.mxu0 %vm636_vm2, %v514_v44  ;;  %549 = vmatpush3.bf16.xpose.msk.msra.mxu1 %vm663_vm3, %v544_v39 }
  0x29   :  { %552 = vmatprep.subr.msk.bf16.mxu1 %vm663_vm3, %v550_v45 }
  0x2f   :  { %519 = vmatpush3.bf16.xpose.msk.msra.mxu0 %vm636_vm2, %v514_v44 }
  0x30   :  { %555 = vmatpush3.bf16.xpose.msk.msra.mxu1 %vm663_vm3, %v550_v45 }
  0x36   :  { %455 = vmatmul.mubr.msk.f32.vlgmr.msra.gmra.mrb[0].mxu0 %vm50_vm0, %v632_v2 }
  0x93   :  { %v186_v47 = vpop.xlane.xlu0 %185 }
  0x94   :  { %v190_v48 = vadd.f32 %v186_v47, %v173_v46 }
  0x96   :  { %193 = vst.msk [vmem:[#allocation3] sm:$0xff] %vm31_vm1, %v190_v48 }
  0x97   :  { %v189_v50 = vpop.xlane.xlu0 %188 }
  0x98   :  { %v191_v51 = vadd.f32 %v189_v50, %v174_v49 }
  0x9a   :  { %194 = vst.msk [vmem:[#allocation3 + $0x8] sm:$0xff] %vm31_vm1, %v191_v51 }
  0x9d   :  { %v198_v52 = vld [vmem:[#allocation3] sm:$0xff] }
  0x9e   :  { %481 = vmatprep.mubr.msk.f32.mxu1 %vm31_vm1, %v198_v52 }
  0xa1   :  { %v199_v53 = vld [vmem:[#allocation3 + $0x8] sm:$0xff] }
  0xa2   :  { %482 = vmatmul.mubr.msk.f32.vlgmr.msra.gmra.mrb[0].mxu1 %vm31_vm1, %v199_v53 }
 0x109   :  { %v456_v56 = vpop.f32.mrb[0].mxu0 }
 0x10a   :  { %v169_v57 = vadd.f32 %v456_v56, %v37_v54  ;;  %v159_v58 = vpop.f32.mrb[1].mxu0 }
 0x10b   :  { %v168_v59 = vadd.f32 %v159_v58, %v36_v55 }
 0x10c   :  { %172 = vst.msk [vmem:[#allocation2 + $0x8] sm:$0xff] %vm28_vm4, %v169_v57 }
 0x10d   :  { %171 = vst.msk [vmem:[#allocation2] sm:$0xff] %vm28_vm4, %v168_v59 }
 0x113   :  { %v330_v61 = vld [vmem:[#allocation2 + $0x8] sm:$0xff] }
 0x114   :  { %v329_v0 = vld [vmem:[#allocation2] sm:$0xff] }
 0x175   :  { %v483_v60 = vpop.f32.mrb[0].mxu1 }
 0x176   :  { %v332_v62 = vmul.f32 8.0, %v483_v60  ;;  %v320_v63 = vpop.f32.mrb[1].mxu1 }
 0x177   :  { %v331_v2 = vmul.f32 8.0, %v320_v63 }
 0x178   :  { %v334_v3 = vadd.f32 %v332_v62, %v330_v61 }
 0x179   :  { %v333_v5 = vadd.f32 %v331_v2, %v329_v0 }
 0x17a   :  { %v343_v6 = vadd.f32 %v400_v1, %v334_v3 }
 0x17b   :  { %v342_v7 = vadd.f32 %v400_v1, %v333_v5 }
 0x17c   :  { %v352_v8 = vmul.f32 %v401_v4, %v343_v6 }
 0x17d   :  { %v351_v9 = vmul.f32 %v401_v4, %v342_v7 }
 0x17e   :  { %354 = vst.msk [vmem:[#allocation4 + $0x8] sm:$0xff] %vm28_vm4, %v352_v8 }
 0x17f   :  { %353 = vst.msk [vmem:[#allocation4] sm:$0xff] %vm28_vm4, %v351_v9 }
 0x180   :  { %571 = shalt.err (!%p568_p4)
}
 0x181   :  { %s572_s28 = scalar_lea.hbm %s808_s6, 256 }
 0x182   :  { %p573_p5 = scmp.ne.s32.totalorder %s808_s6, %s572_s28  ;;  %p576_p6 = scmp.lt.u32.totalorder %s572_s28, %s808_s6 }
 0x184   :  { %p578_p7 = pnand %p576_p6, %p573_p5 }
 0x186   :  { %581 = shalt.err (!%p578_p7)
}
 0x187   :  { %s586_s7 = smov 128   ;;  %s587_s8 = smov 8  }
 0x188   :  { %366 = dma.vmem_to_hbm [thread:$0]  %s361_s26, 256, %s808_s6, [#allocation5], %s586_s7, %s586_s7, %s587_s8  }
 0x189   :  { %582 = dma.done.wait [#allocation5], 256  }
 0x18a   :  { %583 = vsyncadd [#allocation5], 4294967040 }
 0x18b   :  { %370 = vsyncpa [#allocation5], 1 }

</bundles_post_ra>
